<compile_context>
chip_gen: v6e
topology: v6e:2x2x1
jax: 0.10.0
libtpu: 0.0.40
codegen_flags: <defaults>
</compile_context>

<pallas_src>
import jax
import jax.numpy as jnp
import numpy as np
from jax.experimental import pallas as pl
from jax.experimental.pallas import tpu as pltpu

# ---- model dims (structure identical to MyCNN; spatial scaled down from 224) ----
B = 2
CIN = 3
H = W = 32
KH = KW = 3
COUT = 16
FC_OUT = 10
HOUT, WOUT = H - KH + 1, W - KW + 1            # 30, 30
FC_IN = COUT * HOUT * WOUT                     # module: 16 * 222 * 222

KTAPS = KH * KW * CIN                          # 27: im2col contraction depth
NCORES = 2                                     # leading "parallel" grid axis (v7x megacore)
TH = 8                                         # conv-output rows per grid step
TROWS = TH * W                                 # spatial tile (lane dim) = 256
assert TROWS % 128 == 0                        # lane-dense blocks, (8,128)-aligned

# Pad conv-output rows so the reduction grid tiles evenly across cores; padded
# rows / wrap columns get ZERO fc weight, so they contribute nothing.
HOUT_PAD = ((HOUT + TH * NCORES - 1) // (TH * NCORES)) * (TH * NCORES)   # 32
S_PAD = HOUT_PAD * W                           # padded flattened conv-output spatial
N_TILES = S_PAD // TROWS
TILES_PER_CORE = N_TILES // NCORES
assert N_TILES % NCORES == 0
# Source slab length: every tap shift (kh*W + kw) must stay in bounds.
SRC_LEN = S_PAD + (KH - 1) * W + (KW - 1)


def fused_cnn_kernel(xt_ref, wconv_ref, wfc_ref, o_ref):
    """grid = (core, reduction step). o_ref is this core's resident partial accumulator."""
    r = pl.program_id(1)

    @pl.when(r == 0)
    def _init():
        o_ref[...] = jnp.zeros_like(o_ref)     # bias is added in the wrapper epilogue

    wfc = wfc_ref[...]                         # (FC_OUT, COUT, TROWS)  lane-dense
    cols = []
    for b in range(B):                         # B is tiny; unrolled
        # conv1 for this spatial tile: ONE K=27 im2col GEMM, lane-dense output
        y = jnp.dot(wconv_ref[...], xt_ref[b],
                    preferred_element_type=jnp.float32)          # (COUT, TROWS)
        # flatten + fc partial: one broadcast multiply + lane reductions
        z = jnp.sum(wfc * y[None, :, :], axis=-1)                # (FC_OUT, COUT)
        p = jnp.sum(z, axis=-1, keepdims=True)                   # (FC_OUT, 1)
        cols.append(p)
    o_ref[...] = o_ref[...] + jnp.concatenate(cols, axis=1)      # (FC_OUT, B)


def prepare_params(conv_w, conv_b, fc_w, fc_b):
    """One-time parameter re-layout, hoisted out of the forward pass."""
    # conv weight -> (COUT, KH*KW*CIN), columns ordered (kh, kw, cin) to match the slab.
    w_conv_mat = jnp.transpose(conv_w, (0, 2, 3, 1)).reshape(COUT, KTAPS)
    # fc weight: PyTorch flattens NCHW as (cout, h, w).  Re-layout once to
    # (FC_OUT, COUT, spatial) with spatial = h*W + w, zero-padding the wrap
    # columns (w in [WOUT, W)) and the extra rows (h in [HOUT, HOUT_PAD)).
    w4 = fc_w.reshape(FC_OUT, COUT, HOUT, WOUT)
    w4 = jnp.pad(w4, ((0, 0), (0, 0), (0, HOUT_PAD - HOUT), (0, W - WOUT)))
    w_fc_p = w4.reshape(FC_OUT, COUT, S_PAD)
    # Fold the conv bias into the fc bias (the fc is linear, so this is exact).
    b_eff = fc_b + jnp.einsum('ocp,c->o', w_fc_p, conv_b)
    return w_conv_mat, w_fc_p, b_eff


def my_cnn_forward(x_nchw, w_conv_mat, w_fc_p, b_eff):
    """MyCNN.forward: conv1(3x3, valid) -> flatten -> fc, fused into one kernel."""
    # Layout plumbing only: NCHW -> channels-major flat spatial, then 9 shifted
    # copies (one per conv tap) stacked into a lane-dense K=27 im2col slab.
    x_flat = x_nchw.reshape(B, CIN, H * W)
    x_flat = jnp.pad(x_flat, ((0, 0), (0, 0), (0, SRC_LEN - H * W)))
    taps = [x_flat[:, :, kh * W + kw: kh * W + kw + S_PAD]
            for kh in range(KH) for kw in range(KW)]
    xtaps = jnp.stack(taps, axis=1).reshape(B, KTAPS, S_PAD)     # (B, 27, S_PAD)

    out = pl.pallas_call(
        fused_cnn_kernel,
        out_shape=jax.ShapeDtypeStruct((NCORES, FC_OUT, B), jnp.float32),
        grid=(NCORES, TILES_PER_CORE),
        in_specs=[
            # im2col slab: streamed spatial-tile by spatial-tile (lane-dense)
            pl.BlockSpec((B, KTAPS, TROWS),
                         lambda p, r: (0, 0, p * TILES_PER_CORE + r)),
            # tiny conv weight: resident
            pl.BlockSpec((COUT, KTAPS), lambda p, r: (0, 0)),
            # fc weight: streamed tile-by-tile, read from HBM exactly once
            pl.BlockSpec((FC_OUT, COUT, TROWS),
                         lambda p, r: (0, 0, p * TILES_PER_CORE + r)),
        ],
        # per-core resident partial accumulator (revisited across the reduction axis)
        out_specs=pl.BlockSpec((None, FC_OUT, B), lambda p, r: (p, 0, 0)),
        compiler_params=pltpu.CompilerParams(
            dimension_semantics=("parallel", "arbitrary"),
            vmem_limit_bytes=32 * 1024 * 1024),
    )(xtaps, w_conv_mat, w_fc_p)

    # Trivial epilogue: sum per-core partials, orient to (B, FC_OUT), add folded bias.
    return out.sum(axis=0).T + b_eff[None, :]


# ---------------- pure-JAX reference (PyTorch semantics) ----------------
def reference_forward(x_nchw, conv_w, conv_b, fc_w, fc_b):
    y = jax.lax.conv_general_dilated(
        x_nchw, conv_w, window_strides=(1, 1), padding='VALID',
        dimension_numbers=('NCHW', 'OIHW', 'NCHW'))
    y = y + conv_b.reshape(1, COUT, 1, 1)
    flat = y.reshape(x_nchw.shape[0], -1)       # NCHW flatten, like x.view(B, -1)
    return flat @ fc_w.T + fc_b


if __name__ == "__main__":
    key = jax.random.PRNGKey(0)
    k1, k2, k3, k4, k5 = jax.random.split(key, 5)

    # deterministic synthetic parameters (shapes from MyCNN.__init__, scaled spatially)
    conv_w = jax.random.normal(k1, (COUT, CIN, KH, KW), jnp.float32) * 0.1
    conv_b = jax.random.normal(k2, (COUT,), jnp.float32) * 0.1
    fc_w = jax.random.normal(k3, (FC_OUT, FC_IN), jnp.float32) * 0.02
    fc_b = jax.random.normal(k4, (FC_OUT,), jnp.float32) * 0.02
    x = jax.random.normal(k5, (B, CIN, H, W), jnp.float32)

    params = prepare_params(conv_w, conv_b, fc_w, fc_b)   # hoisted, one-time
    out = jax.block_until_ready(my_cnn_forward(x, *params))

    ref = jax.block_until_ready(reference_forward(x, conv_w, conv_b, fc_w, fc_b))
    np.testing.assert_allclose(np.asarray(out), np.asarray(ref), rtol=1e-4, atol=1e-3)

    print("KERNEL_OK")
</pallas_src>

<mosaic_0001>
module attributes {stable_mosaic.version = 11 : i64} {
  func.func @fused_cnn_kernel(%arg0: i32, %arg1: i32, %arg2: memref<2x27x256xf32, #tpu.memory_space<vmem>>, %arg3: memref<16x27xf32, #tpu.memory_space<vmem>>, %arg4: memref<10x16x256xf32, #tpu.memory_space<vmem>>, %arg5: memref<1x10x2xf32, #tpu.memory_space<vmem>>) attributes {dimension_semantics = [#tpu.dimension_semantics<parallel>, #tpu.dimension_semantics<arbitrary>], iteration_bounds = array<i64: 2, 2>, scalar_prefetch = 0 : i64, scratch_operands = 0 : i64, tpu.core_type = #tpu.core_type<tc>, window_params = [{transform_indices = @transform_0, window_bounds = array<i64: 2, 27, 256>}, {pipeline_mode = #tpu.pipeline_mode<synchronous>, transform_indices = @transform_1, window_bounds = array<i64: 16, 27>}, {transform_indices = @transform_2, window_bounds = array<i64: 10, 16, 256>}, {transform_indices = @transform_3, window_bounds = array<i64: 1, 10, 2>}]} {
    %c0_i32 = arith.constant 0 : i32
    %0 = arith.cmpi eq, %arg1, %c0_i32 : i32
    %1 = arith.extui %0 : i1 to i32
    %c0_i32_0 = arith.constant 0 : i32
    %2 = arith.cmpi ne, %1, %c0_i32_0 : i32
    scf.if %2 {
      %cst_23 = arith.constant 0.000000e+00 : f32
      %31 = vector.broadcast %cst_23 : f32 to vector<10x2xf32>
      %c0_24 = arith.constant 0 : index
      %c0_25 = arith.constant 0 : index
      %c0_26 = arith.constant 0 : index
      %32 = vector.load %arg5[%c0_24, %c0_25, %c0_26] : memref<1x10x2xf32, #tpu.memory_space<vmem>>, vector<1x10x2xf32>
      %33 = vector.shape_cast %32 : vector<1x10x2xf32> to vector<10x2xf32>
      %34 = vector.shape_cast %31 : vector<10x2xf32> to vector<1x10x2xf32>
      tpu.vector_store %arg5[%c0_24, %c0_25, %c0_26], %34 {strides = array<i32>} : memref<1x10x2xf32, #tpu.memory_space<vmem>>, vector<1x10x2xf32>,
    } else {
    }
    %c0 = arith.constant 0 : index
    %c0_1 = arith.constant 0 : index
    %c0_2 = arith.constant 0 : index
    %3 = vector.load %arg4[%c0, %c0_1, %c0_2] : memref<10x16x256xf32, #tpu.memory_space<vmem>>, vector<10x16x256xf32>
    %c0_3 = arith.constant 0 : index
    %c0_4 = arith.constant 0 : index
    %4 = vector.load %arg3[%c0_3, %c0_4] : memref<16x27xf32, #tpu.memory_space<vmem>>, vector<16x27xf32>
    %c0_5 = arith.constant 0 : index
    %c0_6 = arith.constant 0 : index
    %c0_7 = arith.constant 0 : index
    %5 = vector.load %arg2[%c0_5, %c0_6, %c0_7] : memref<2x27x256xf32, #tpu.memory_space<vmem>>, vector<1x27x256xf32>
    %6 = vector.shape_cast %5 : vector<1x27x256xf32> to vector<27x256xf32>
    %cst = arith.constant dense<0.000000e+00> : vector<16x256xf32>
    %7 = tpu.matmul %4, %6, %cst {dimension_numbers = #tpu.dot_dimension_numbers<[1], [0], [0], [1], [0, 0, 1, 1], [], []>} : vector<16x27xf32>, vector<27x256xf32>, vector<16x256xf32> -> vector<16x256xf32>
    %8 = vector.shape_cast %7 : vector<16x256xf32> to vector<1x16x256xf32>
    %9 = vector.broadcast %8 : vector<1x16x256xf32> to vector<10x16x256xf32>
    %10 = arith.mulf %3, %9 : vector<10x16x256xf32>
    %cst_8 = arith.constant dense<0.000000e+00> : vector<10x16xf32>
    %11 = vector.multi_reduction <add>, %10, %cst_8 [2] : vector<10x16x256xf32> to vector<10x16xf32>
    %cst_9 = arith.constant dense<0.000000e+00> : vector<10xf32>
    %12 = vector.multi_reduction <add>, %11, %cst_9 [1] : vector<10x16xf32> to vector<10xf32>
    %13 = vector.shape_cast %12 : vector<10xf32> to vector<10x1xf32>
    %c0_10 = arith.constant 0 : index
    %c0_11 = arith.constant 0 : index
    %14 = vector.load %arg3[%c0_10, %c0_11] : memref<16x27xf32, #tpu.memory_space<vmem>>, vector<16x27xf32>
    %c1 = arith.constant 1 : index
    %c0_12 = arith.constant 0 : index
    %c0_13 = arith.constant 0 : index
    %15 = vector.load %arg2[%c1, %c0_12, %c0_13] : memref<2x27x256xf32, #tpu.memory_space<vmem>>, vector<1x27x256xf32>
    %16 = vector.shape_cast %15 : vector<1x27x256xf32> to vector<27x256xf32>
    %cst_14 = arith.constant dense<0.000000e+00> : vector<16x256xf32>
    %17 = tpu.matmul %14, %16, %cst_14 {dimension_numbers = #tpu.dot_dimension_numbers<[1], [0], [0], [1], [0, 0, 1, 1], [], []>} : vector<16x27xf32>, vector<27x256xf32>, vector<16x256xf32> -> vector<16x256xf32>
    %18 = vector.shape_cast %17 : vector<16x256xf32> to vector<1x16x256xf32>
    %19 = vector.broadcast %18 : vector<1x16x256xf32> to vector<10x16x256xf32>
    %20 = arith.mulf %3, %19 : vector<10x16x256xf32>
    %cst_15 = arith.constant dense<0.000000e+00> : vector<10x16xf32>
    %21 = vector.multi_reduction <add>, %20, %cst_15 [2] : vector<10x16x256xf32> to vector<10x16xf32>
    %cst_16 = arith.constant dense<0.000000e+00> : vector<10xf32>
    %22 = vector.multi_reduction <add>, %21, %cst_16 [1] : vector<10x16xf32> to vector<10xf32>
    %23 = vector.shape_cast %22 : vector<10xf32> to vector<10x1xf32>
    %c0_17 = arith.constant 0 : index
    %c0_18 = arith.constant 0 : index
    %c0_19 = arith.constant 0 : index
    %24 = vector.load %arg5[%c0_17, %c0_18, %c0_19] : memref<1x10x2xf32, #tpu.memory_space<vmem>>, vector<1x10x2xf32>
    %25 = vector.shape_cast %24 : vector<1x10x2xf32> to vector<10x2xf32>
    %26 = tpu.concatenate %13, %23 in 1 : vector<10x1xf32>, vector<10x1xf32> -> vector<10x2xf32>
    %27 = arith.addf %25, %26 : vector<10x2xf32>
    %c0_20 = arith.constant 0 : index
    %c0_21 = arith.constant 0 : index
    %c0_22 = arith.constant 0 : index
    %28 = vector.load %arg5[%c0_20, %c0_21, %c0_22] : memref<1x10x2xf32, #tpu.memory_space<vmem>>, vector<1x10x2xf32>
    %29 = vector.shape_cast %28 : vector<1x10x2xf32> to vector<10x2xf32>
    %30 = vector.shape_cast %27 : vector<10x2xf32> to vector<1x10x2xf32>
    tpu.vector_store %arg5[%c0_20, %c0_21, %c0_22], %30 {strides = array<i32>} : memref<1x10x2xf32, #tpu.memory_space<vmem>>, vector<1x10x2xf32>,
    return
  }
  func.func @transform_0(%arg0: i32, %arg1: i32) -> (i32, i32, i32) {
    %c2_i32 = arith.constant 2 : i32
    %0 = arith.muli %arg0, %c2_i32 : i32
    %1 = arith.addi %0, %arg1 : i32
    %c0_i32 = arith.constant 0 : i32
    %c0_i32_0 = arith.constant 0 : i32
    %c0_i32_1 = arith.constant 0 : i32
    return %c0_i32, %c0_i32_0, %1 : i32, i32, i32
  }
  func.func @transform_1(%arg0: i32, %arg1: i32) -> (i32, i32) {
    %c0_i32 = arith.constant 0 : i32
    %c0_i32_0 = arith.constant 0 : i32
    %c0_i32_1 = arith.constant 0 : i32
    return %c0_i32, %c0_i32_0 : i32, i32
  }
  func.func @transform_2(%arg0: i32, %arg1: i32) -> (i32, i32, i32) {
    %c2_i32 = arith.constant 2 : i32
    %0 = arith.muli %arg0, %c2_i32 : i32
    %1 = arith.addi %0, %arg1 : i32
    %c0_i32 = arith.constant 0 : i32
    %c0_i32_0 = arith.constant 0 : i32
    %c0_i32_1 = arith.constant 0 : i32
    return %c0_i32, %c0_i32_0, %1 : i32, i32, i32
  }
  func.func @transform_3(%arg0: i32, %arg1: i32) -> (i32, i32, i32) {
    %c0_i32 = arith.constant 0 : i32
    %c0_i32_0 = arith.constant 0 : i32
    %c0_i32_1 = arith.constant 0 : i32
    return %arg0, %c0_i32, %c0_i32_0 : i32, i32, i32
  }
}

</mosaic_0001>

<bundles_post_ra>
// kernel: tpu_custom_call.1
= control target key start
LH: loop header
LB: loop body
LE: loop exit
PB: predicated region body
PF: predicated region fallthrough
CT: control target
= control target key end

     0   :  { %8 = vsyncpa [#allocation4], 0  ;;  %s1829_s0 = inlined_call_operand.vmem [shape: f32[2,27,1024], index: 0, kind: input, shape index: {}]   ;;  %s1830_s1 = inlined_call_operand.vmem [shape: f32[16,27], index: 1, kind: input, shape index: {}]   ;;  %s1831_s2 = inlined_call_operand.hbm [shape: f32[10,16,1024], index: 2, kind: input, shape index: {}]   ;;  %s1832_s3 = inlined_call_operand.vmem [shape: f32[2,10,2], index: 3, kind: output, shape index: {}]  }
   0x1   :  { %10 = vsyncpa [#allocation4 + $0x1], 0  ;;  %s1342_s12 = smov 0   ;;  %s1344_s13 = smov 0  }
   0x2   :  { %s1346_s14 = smov 0   ;;  %s1348_s15 = smov 0  }
   0x3   :  { %s1350_s16 = smov 0   ;;  %s1352_s17 = smov 0  }
   0x4   :  { %s1354_s18 = smov 0   ;;  %s1356_s19 = smov 0  }
   0x5 LB: > { %s25_s20 = sadd.s32 1, %s1306_s17  ;;  %s28_s21 = sadd.s32 1, %s1310_s18  ;;  %s1314_s19 = sphi %s1356_s19, %s16_s19   ;;  %s1310_s18 = sphi %s1354_s18, %s1841_s18   ;;  %s1306_s17 = sphi %s1352_s17, %s1840_s17   ;;  %s1302_s16 = sphi %s1350_s16, %s1839_s16   ;;  %s1298_s15 = sphi %s1348_s15, %s1838_s15   ;;  %s1294_s14 = sphi %s1346_s14, %s1837_s14   ;;  %s1290_s13 = sphi %s1344_s13, %s1836_s13   ;;  %s1286_s12 = sphi %s1342_s12, %s1835_s12  }
   0x6   : > { %p26_p0 = scmp.ge.s32.totalorder %s25_s20, 2  ;;  %s1108_s22 = sadd.s32 4294967295, %s1314_s19  }
   0x7   : > { %s1110_s23 = sshll.u32 %s1310_s18, 1  ;;  %p46_p1 = scmp.ne.s32.totalorder %s1294_s14, %s1290_s13 }
   0x8   : > { %s1843_s20 = smov (%p26_p0, %s25_s20), 0  ;;  %s1845_s21 = smov (!%p26_p0, %s28_s21), %s1310_s18 }
   0x9   : > { %s1388_s24 = sadd.s32 %s1306_s17, %s1110_s23  ;;  %p30_p2 = scmp.ge.s32.totalorder %s1845_s21, 2 }
   0xa   : > { %p47_p3 = scmp.eq.s32.totalorder %s1314_s19, 0  ;;  %p103_p4 = scmp.ne.s32.totalorder %s1290_s13, %s1286_s12 }
   0xb   : > { %p104_p5 = scmp.eq.s32.totalorder %s1108_s22, 0  ;;  %s1847_s21 = smov (%p30_p2, %s1845_s21), 0 }
   0xc   : > { %p1396_p6 = por %p47_p3, %p46_p1  ;;  %s1111_s27 = sshll.u32 %s1847_s21, 1 }
   0xd   : > { %p1400_p7 = por %p104_p5, %p103_p4  ;;  %s35_s28 = sadd.s32 %s1111_s27, %s1843_s20 }
   0xe   : > { %s36_s29 = ssub.s32 %s1388_s24, %s35_s28  ;;  %s39_s30 = sadd.s32 1, %s1294_s14 }
   0xf   : > { %p37_p8 = scmp.eq.s32.totalorder %s36_s29, 0  ;;  %p1115_p9 = scmp.ge.s32.totalorder %s1314_s19, 4 }
  0x11   : > { %s1409_s4 = scalar_select %p37_p8, %s1294_s14, %s39_s30  }
  0x12   : > { %152 = sbr.rel (%p1115_p9) target bundleno = 53 (0x35), region = 20 }
  0x17   : > { %155 = sbr.rel (!%p1396_p6) target bundleno = 35 (0x23), region = 24  ;;  %s157_s5 = sand.u32 (%p1396_p6), 1, %s1294_s14  }
  0x18   : > { %s1146_s6 = sshll.u32 (%p1396_p6), %s1388_s24, 4  ;;  %s1116_s7 = sshll.u32 (%p1396_p6), %s157_s5, 7 }
  0x19   : > { %s1419_s10 = scalar_lea.vmem (%p1396_p6), %s1829_s0, %s1146_s6  ;;  %s159_s11 = scalar_lea.vmem (%p1396_p6), [#allocation2], %s1116_s7 }
  0x1a   : > { %v177_v0 = vld [vmem:[%s1419_s10] sm:$0xff] (%p1396_p6)  ;;  %v179_v1 = vld [vmem:[%s1419_s10 + $0x8] sm:$0xff] (%p1396_p6) }
  0x1b   : > { %v181_v2 = vld [vmem:[%s1419_s10 + $0x40] sm:$0xff] (%p1396_p6)  ;;  %178 = vst [vmem:[%s159_s11] sm:$0xff] (%p1396_p6), %v177_v0  ;;  %180 = vst [vmem:[%s159_s11 + $0x8] sm:$0xff] (%p1396_p6), %v179_v1  ;;  %v183_v3 = vld [vmem:[%s1419_s10 + $0x48] sm:$0xff] (%p1396_p6) }
  0x1c   : > { %182 = vst [vmem:[%s159_s11 + $0x10] sm:$0xff] %v181_v2  ;;  %v185_v4 = vld [vmem:[%s1419_s10 + $0x80] sm:$0xff]  ;;  %v187_v5 = vld [vmem:[%s1419_s10 + $0x88] sm:$0xff]  ;;  %184 = vst [vmem:[%s159_s11 + $0x18] sm:$0xff] %v183_v3 }
  0x1d   : > { %186 = vst [vmem:[%s159_s11 + $0x20] sm:$0xff] %v185_v4  ;;  %188 = vst [vmem:[%s159_s11 + $0x28] sm:$0xff] %v187_v5  ;;  %v189_v6 = vld [vmem:[%s1419_s10 + $0xc0] sm:$0xff]  ;;  %v191_v7 = vld [vmem:[%s1419_s10 + $0xc8] sm:$0xff] }
  0x1e   : > { %v193_v8 = vld [vmem:[%s1419_s10 + $0x100] sm:$0xff]  ;;  %190 = vst [vmem:[%s159_s11 + $0x30] sm:$0xff] %v189_v6  ;;  %192 = vst [vmem:[%s159_s11 + $0x38] sm:$0xff] %v191_v7  ;;  %v195_v9 = vld [vmem:[%s1419_s10 + $0x108] sm:$0xff] }
  0x1f   : > { %194 = vst [vmem:[%s159_s11 + $0x40] sm:$0xff] %v193_v8  ;;  %v197_v10 = vld [vmem:[%s1419_s10 + $0x140] sm:$0xff]  ;;  %v199_v11 = vld [vmem:[%s1419_s10 + $0x148] sm:$0xff]  ;;  %196 = vst [vmem:[%s159_s11 + $0x48] sm:$0xff] %v195_v9 }
  0x20   : > { %198 = vst [vmem:[%s159_s11 + $0x50] sm:$0xff] %v197_v10  ;;  %200 = vst [vmem:[%s159_s11 + $0x58] sm:$0xff] %v199_v11  ;;  %v201_v12 = vld [vmem:[%s1419_s10 + $0x180] sm:$0xff]  ;;  %v203_v13 = vld [vmem:[%s1419_s10 + $0x188] sm:$0xff] }
  0x21   : > { %v205_v14 = vld [vmem:[%s1419_s10 + $0x1c0] sm:$0xff]  ;;  %202 = vst [vmem:[%s159_s11 + $0x60] sm:$0xff] %v201_v12  ;;  %204 = vst [vmem:[%s159_s11 + $0x68] sm:$0xff] %v203_v13  ;;  %v207_v15 = vld [vmem:[%s1419_s10 + $0x1c8] sm:$0xff] }
  0x22   : > { %206 = vst [vmem:[%s159_s11 + $0x70] sm:$0xff] %v205_v14  ;;  %208 = vst [vmem:[%s159_s11 + $0x78] sm:$0xff] %v207_v15 }
  0x23 PF: > { %s215_s12 = sand.u32 1, %s1294_s14   ;;  %s1147_s22 = sshll.u32 %s1388_s24, 8 }
  0x24   : > { %s1149_s23 = smul.u32 320, %s215_s12  ;;  %s227_s29 = scalar_lea.hbm %s1831_s2, %s1147_s22 }
  0x25   : > { %s216_s6 = scalar_lea.sflag [#allocation4], %s215_s12  ;;  %s1316_s8 = smov [#allocation3]  }
  0x26   : > { %s219_s30 = scalar_lea.vmem [#allocation3], %s1149_s23  ;;  %s1238_s9 = sshll.u32 %s1316_s8, 4  ;;  %s1239_s9 = int_to_ptr.vmem [resolvable:$false] %s1238_s9 }
  0x27   : > { %s228_s5 = sshll.u32 %s219_s30, 4  ;;  %s1240_s10 = scalar_lea.vmem %s1239_s9, 10240  ;;  %s229_s5 = int_to_ptr.vmem [resolvable:$true] %s228_s5 }
  0x28   : > { %s1234_s7 = scalar_lea.vmem %s229_s5, 5120  ;;  %p1241_p13 = scmp.lt.s32.totalorder %s229_s5, %s1239_s9 }
  0x29   : > { %p1235_p10 = scmp.ne.s32.totalorder %s229_s5, %s1234_s7  ;;  %p1242_p0 = scmp.lt.s32.totalorder %s1240_s10, %s1234_s7 }
  0x2b   : > { %p1236_p11 = pnand %p1235_p10, %p1396_p6  ;;  %p1243_p1 = por %p1242_p0, %p1241_p13 }
  0x2d   : > { %p1237_p12 = pneg %p1236_p11 }
  0x2f   : > { %p1244_p2 = pnand %p1243_p1, %p1237_p12 }
  0x31   : > { %1247 = shalt.err (!%p1244_p2)
}
  0x32   : > { %s1317_s24 = smov 1024   ;;  %s1318_s11 = smov 256  }
  0x33   : > { %s1319_s22 = smov 16  }
  0x34   : > { %1151 = dma.hbm_to_vmem [thread:$0]  (%p1396_p6), %s227_s29, 5120, %s229_s5, %s216_s6, %s1317_s24, %s1318_s11, %s1319_s22  }
  0x35 PF: > { %p1123_p3 = scmp.ge.s32.totalorder %s1314_s19, 1  ;;  %p236_p4 = scmp.lt.s32.totalorder %s1314_s19, 5 }
  0x37   : > { %p237_p5 = pnand %p1123_p3, %p236_p4 }
  0x38   : > { %s243_s12 = sand.u32 (!%p237_p5), 1, %s1290_s13  }
  0x39   : > { %240 = sbr.rel (%p237_p5) target bundleno = 644 (0x284), region = 51  ;;  %s1124_s23 = sshll.u32 (!%p237_p5), %s243_s12, 7 }
  0x3a   : > { %s1150_s27 = smul.u32 (!%p237_p5), 320, %s243_s12  ;;  %s1449_s28 = scalar_lea.vmem (!%p237_p5), [#allocation2], %s1124_s23 }
  0x3b   : > { %s250_s30 = scalar_lea.sflag (!%p237_p5), [#allocation4], %s243_s12 }
  0x3c   : > { %s1451_s7 = scalar_lea.vmem (!%p237_p5), [#allocation3], %s1150_s27 }
  0x3e   : > { %1281 = dma.done.wait (%p1400_p7), %s250_s30, 5120  }
  0x3f   : > { %1283 = vsyncadd (%p1400_p7), %s250_s30, 4294962176  ;;  %p286_p6 = scmp.lt.s32.totalorder %s1302_s16, 1  ;;  %p1127_p8 = scmp.ne.s32.totalorder %s1298_s15, 0 }
  0x41   : > { %s1849_s16 = smov (!%p286_p6, %s1302_s16), 1  ;;  %294 = sbr.rel (%p1127_p8) target bundleno = 73 (0x49), region = 63 }
  0x42   : > { %s1148_s25 = sshll.u32 %s1849_s16, 4 }
  0x43   : > { %s1462_s6 = scalar_lea.vmem %s1832_s3, %s1148_s25 }
  0x46   : > { %vm295_vm0 = vcmask 15360   ;;  %vm297_vm1 = vcmask 9216   ;;  %v1320_v16 = vmov 0.0  }
  0x47   : > { %296 = vst.msk [vmem:[%s1462_s6] sm:$0xff] %vm295_vm0, %v1320_v16 }
  0x48   : > { %298 = vst.msk [vmem:[%s1462_s6 + $0x8] sm:$0x3] %vm297_vm1, %v1320_v16 }
  0x49 PF: > { %v348_v17 = vld [vmem:[%s1449_s28 + $0x38] sm:$0x7]  ;;  %vm356_vm2 = vcmask 1042432   ;;  %v347_v18 = vld [vmem:[%s1449_s28 + $0x30] sm:$0x7]  ;;  %v346_v19 = vld [vmem:[%s1449_s28 + $0x28] sm:$0xff] }
  0x4a   : > { %1128 = vmatprep.subr.msk.mxu0 %vm356_vm2, %v348_v17  ;;  %v1139_v20 = vld [vmem:[%s1449_s28 + $0x78] sm:$0x7]  ;;  %v345_v21 = vld [vmem:[%s1449_s28 + $0x20] sm:$0xff]  ;;  %v1138_v22 = vld [vmem:[%s1449_s28 + $0x70] sm:$0x7]  ;;  %vm349_vm3 = vcmask 220160  }
  0x4b   : > { %1129 = vmatpush1.msk.msra.mxu0 %vm356_vm2, %v347_v18  ;;  %1140 = vmatprep.subr.msk.mxu1 %vm356_vm2, %v1139_v20  ;;  %v344_v23 = vld [vmem:[%s1449_s28 + $0x18] sm:$0xff]  ;;  %v1137_v24 = vld [vmem:[%s1449_s28 + $0x68] sm:$0xff]  ;;  %v343_v25 = vld [vmem:[%s1449_s28 + $0x10] sm:$0xff]  ;;  %v1321_v33 = vmov 0.0   ;;  %vm571_vm4 = vcmask 130112   ;;  %vm654_vm5 = vcmask 1041409  }
  0x4c   : > { %389 = vmatprep.subr.mxu0 %v346_v19  ;;  %1141 = vmatpush1.msk.msra.mxu1 %vm356_vm2, %v1138_v22  ;;  %v1136_v26 = vld [vmem:[%s1449_s28 + $0x60] sm:$0xff]  ;;  %v1135_v27 = vld [vmem:[%s1449_s28 + $0x58] sm:$0xff]  ;;  %v342_v28 = vld [vmem:[%s1449_s28 + $0x8] sm:$0xff]  ;;  %vm656_vm6 = vcmask 1042434   ;;  %vm658_vm7 = vcmask 1043459   ;;  %vm660_vm8 = vcmask 1044484  }
  0x4d   : > { %390 = vmatpush1.msra.mxu0 %v345_v21  ;;  %720 = vmatprep.subr.mxu1 %v1137_v24  ;;  %v341_v29 = vld [vmem:[%s1449_s28] sm:$0xff]  ;;  %v1134_v30 = vld [vmem:[%s1449_s28 + $0x50] sm:$0xff]  ;;  %v1133_v32 = vld [vmem:[%s1449_s28 + $0x48] sm:$0xff]  ;;  %vm675_vm9 = vcmask 123904   ;;  %vm662_vm10 = vcmask 1045509   ;;  %vm664_vm11 = vcmask 1046534  }
  0x4e   : > { %391 = vmatprep.subr.mxu0 %v344_v23  ;;  %721 = vmatpush1.msra.mxu1 %v1136_v26  ;;  %v339_v31 = vld [vmem:[%s1830_s1] sm:$0xff]  ;;  %v340_v35 = vld [vmem:[%s1830_s1 + $0x8] sm:$0xff]  ;;  %v305_v43 = vld [vmem:[%s1451_s7 + $0x30] sm:$0xff]  ;;  %vm666_vm12 = vcmask 1047559   ;;  %vm671_vm13 = vcmask 130048   ;;  %vm999_vm14 = vcmask 7168  }
  0x4f   : > { %392 = vmatpush1.msra.mxu0 %v343_v25  ;;  %722 = vmatprep.subr.mxu1 %v1135_v27  ;;  %v1132_v34 = vld [vmem:[%s1449_s28 + $0x40] sm:$0xff]  ;;  %v304_v38 = vld [vmem:[%s1451_s7 + $0x28] sm:$0xff]  ;;  %v306_v50 = vld [vmem:[%s1451_s7 + $0x38] sm:$0xff]  ;;  %vm1006_vm15 = vcmask 9216   ;;  %vm1004_vm0 = vcmask 15360  }
  0x50   : > { %393 = vmatprep.subr.mxu0 %v342_v28  ;;  %427 = vmatprep.mubr.f32.mxu0 %v1321_v33  ;;  %v303_v36 = vld [vmem:[%s1451_s7 + $0x20] sm:$0xff]  ;;  %v300_v40 = vld [vmem:[%s1451_s7 + $0x8] sm:$0xff]  ;;  %v1521_v58 = vld [vmem:[%s1451_s7 + $0x10] sm:$0xff] }
  0x51   : > { %394 = vmatpush1.msra.mxu0 %v341_v29  ;;  %723 = vmatpush1.msra.mxu1 %v1134_v30  ;;  %v299_v39 = vld [vmem:[%s1451_s7] sm:$0xff]  ;;  %v302_v62 = vld [vmem:[%s1451_s7 + $0x18] sm:$0xff]  ;;  %v308_v4 = vld [vmem:[%s1451_s7 + $0x48] sm:$0xff] }
  0x52   : > { %1130 = vmatmul.mubr.msk.f32.vlgmr.msra.gmra.mxu0 %vm349_vm3, %v339_v31  ;;  %724 = vmatprep.subr.mxu1 %v1133_v32  ;;  %v307_v6 = vld [vmem:[%s1451_s7 + $0x40] sm:$0xff]  ;;  %v309_v12 = vld [vmem:[%s1451_s7 + $0x50] sm:$0xff]  ;;  %v310_v13 = vld [vmem:[%s1451_s7 + $0x58] sm:$0xff] }
  0x53   : > { %725 = vmatpush1.msra.mxu1 %v1132_v34  ;;  %758 = vmatprep.mubr.f32.mxu1 %v1321_v33  ;;  %v312_v20 = vld [vmem:[%s1451_s7 + $0x68] sm:$0xff]  ;;  %v311_v21 = vld [vmem:[%s1451_s7 + $0x60] sm:$0xff]  ;;  %v313_v23 = vld [vmem:[%s1451_s7 + $0x70] sm:$0xff] }
  0x54   : > { %1142 = vmatmul.mubr.msk.f32.vlgmr.msra.gmra.mxu1 %vm349_vm3, %v339_v31  ;;  %433 = vmatprep.mubr.f32.mxu0 %v1321_v33  ;;  %v314_v24 = vld [vmem:[%s1451_s7 + $0x78] sm:$0xff] }
  0x55   : > { %764 = vmatprep.mubr.f32.mxu1 %v1321_v33 }
  0x56   : > { %1131 = vmatmul.mubr.msk.f32.gmra.mxu0 %vm349_vm3, %v340_v35 }
  0x58   : > { %1143 = vmatmul.mubr.msk.f32.gmra.mxu1 %vm349_vm3, %v340_v35 }
 0x112   : > { %v1494_v37 = vpop.f32.mrf.mxu0 }
 0x113   : > { %v444_v44 = vmul.f32 %v1494_v37, %v303_v36  ;;  %v440_v46 = vmul.f32 %v1494_v37, %v299_v39  ;;  %v448_v11 = vmul.f32 %v1494_v37, %v307_v6  ;;  %v452_v29 = vmul.f32 %v1494_v37, %v311_v21 }
 0x114   : > { %v1499_v41 = vpop.f32.mrf.mxu0  ;;  %v1501_v42 = vpop.f32.mrf.mxu1 }
 0x115   : > { %v445_v45 = vmul.f32 %v1499_v41, %v304_v38  ;;  %v441_v47 = vmul.f32 %v1499_v41, %v300_v40  ;;  %v771_v51 = vmul.f32 %v1501_v42, %v299_v39  ;;  %v775_v63 = vmul.f32 %v1501_v42, %v303_v36  ;;  %v316_v36 = vld [vmem:[%s1451_s7 + $0x88] sm:$0xff] }
 0x116   : > { %v1508_v48 = vpop.f32.mrf.mxu0  ;;  %v1510_v49 = vpop.f32.mrf.mxu1  ;;  %v449_v7 = vmul.f32 %v1499_v41, %v308_v4  ;;  %v779_v15 = vmul.f32 %v1501_v42, %v307_v6  ;;  %v453_v22 = vmul.f32 %v1499_v41, %v312_v20  ;;  %v783_v32 = vmul.f32 %v1501_v42, %v311_v21  ;;  %v1603_v6 = vld [vmem:[%s1451_s7 + $0x128] sm:$0xff]  ;;  %v319_v21 = vld [vmem:[%s1451_s7 + $0xa0] sm:$0xff] }
 0x117   : > { %v486_v52 = vadd.f32 %v445_v45, %v444_v44  ;;  %v480_v53 = vadd.f32 %v441_v47, %v440_v46  ;;  %v446_v54 = vmul.f32 %v1508_v48, %v305_v43  ;;  %v772_v55 = vmul.f32 %v1510_v49, %v300_v40  ;;  %v317_v44 = vld [vmem:[%s1451_s7 + $0x90] sm:$0xff]  ;;  %v1562_v45 = vld [vmem:[%s1451_s7 + $0x100] sm:$0xff] }
 0x118   : > { %v1516_v56 = vpop.f32.mrf.mxu0  ;;  %v1518_v57 = vpop.f32.mrf.mxu1  ;;  %v776_v3 = vmul.f32 %v1510_v49, %v304_v38  ;;  %v492_v14 = vadd.f32 %v449_v7, %v448_v11  ;;  %v450_v17 = vmul.f32 %v1508_v48, %v309_v12  ;;  %v780_v19 = vmul.f32 %v1510_v49, %v308_v4 }
 0x119   : > { %487 = vadd.xlane.f32.xlu1 %v486_v52  ;;  %481 = vadd.xlane.f32.xlu0 %v480_v53  ;;  %v447_v59 = vmul.f32 %v1516_v56, %v306_v50  ;;  %v773_v60 = vmul.f32 %v1518_v57, %v1521_v58  ;;  %v811_v1 = vadd.f32 %v772_v55, %v771_v51  ;;  %v1569_v51 = vld [vmem:[%s1451_s7 + $0x110] sm:$0xff]  ;;  %v1572_v52 = vld [vmem:[%s1451_s7 + $0x118] sm:$0xff] }
 0x11a   : > { %v1526_v61 = vpop.f32.mrf.mxu1  ;;  %v817_v8 = vadd.f32 %v776_v3, %v775_v63  ;;  %v777_v9 = vmul.f32 %v1518_v57, %v305_v43  ;;  %v451_v18 = vmul.f32 %v1516_v56, %v310_v13  ;;  %v823_v26 = vadd.f32 %v780_v19, %v779_v15  ;;  %v315_v43 = vld [vmem:[%s1451_s7 + $0x80] sm:$0xff]  ;;  %v318_v55 = vld [vmem:[%s1451_s7 + $0x98] sm:$0xff] }
 0x11b   : > { %v489_v0 = vadd.f32 %v447_v59, %v446_v54  ;;  %v774_v2 = vmul.f32 %v1526_v61, %v302_v62  ;;  %v778_v10 = vmul.f32 %v1526_v61, %v306_v50  ;;  %v781_v27 = vmul.f32 %v1518_v57, %v309_v12  ;;  %v1566_v50 = vld [vmem:[%s1451_s7 + $0x108] sm:$0xff]  ;;  %v1579_v59 = vld [vmem:[%s1451_s7 + $0x130] sm:$0xff] }
 0x11c   : > { %v495_v25 = vadd.f32 %v451_v18, %v450_v17  ;;  %v782_v28 = vmul.f32 %v1526_v61, %v310_v13  ;;  %v454_v30 = vmul.f32 %v1508_v48, %v313_v23  ;;  %v455_v31 = vmul.f32 %v1516_v56, %v314_v24  ;;  %v320_v18 = vld [vmem:[%s1451_s7 + $0xa8] sm:$0xff] }
 0x11d   : > { %490 = vadd.xlane.f32.xlu1 %v489_v0  ;;  %812 = vadd.xlane.f32.xlu0 %v811_v1  ;;  %v814_v5 = vadd.f32 %v774_v2, %v773_v60  ;;  %v820_v16 = vadd.f32 %v778_v10, %v777_v9  ;;  %v784_v33 = vmul.f32 %v1510_v49, %v312_v20  ;;  %v1582_v60 = vld [vmem:[%s1451_s7 + $0x138] sm:$0xff] }
 0x11e   : > { %v826_v34 = vadd.f32 %v782_v28, %v781_v27  ;;  %v498_v35 = vadd.f32 %v453_v22, %v452_v29  ;;  %v501_v38 = vadd.f32 %v455_v31, %v454_v30  ;;  %v785_v39 = vmul.f32 %v1518_v57, %v313_v23  ;;  %v322_v27 = vld [vmem:[%s1451_s7 + $0xb8] sm:$0xff] }
 0x11f   : > { %v786_v40 = vmul.f32 %v1526_v61, %v314_v24  ;;  %v829_v46 = vadd.f32 %v784_v33, %v783_v32  ;;  %v457_v47 = vmul.f32 %v1499_v41, %v316_v36  ;;  %v442_v53 = vmul.f32 %v1508_v48, %v1521_v58 }
 0x120   : > { %v443_v54 = vmul.f32 %v1516_v56, %v302_v62  ;;  %v805_v63 = vmul.f32 %v1518_v57, %v1569_v51  ;;  %v806_v0 = vmul.f32 %v1526_v61, %v1572_v52  ;;  %v803_v1 = vmul.f32 %v1501_v42, %v1562_v45  ;;  %v1594_v62 = vld [vmem:[%s1451_s7 + $0x120] sm:$0xff] }
 0x121   : > { %815 = vadd.xlane.f32.xlu1 %v814_v5  ;;  %818 = vadd.xlane.f32.xlu0 %v817_v8  ;;  %v804_v58 = vmul.f32 %v1510_v49, %v1566_v50  ;;  %v456_v2 = vmul.f32 %v1494_v37, %v315_v43  ;;  %v809_v4 = vmul.f32 %v1518_v57, %v1579_v59 }
 0x122   : > { %v1596_v3 = vadd.f32 %v443_v54, %v442_v53  ;;  %v810_v5 = vmul.f32 %v1526_v61, %v1582_v60  ;;  %v1605_v7 = vadd.f32 %v806_v0, %v805_v63  ;;  %v807_v9 = vmul.f32 %v1501_v42, %v1594_v62 }
 0x123   : > { %v1607_v8 = vadd.f32 %v804_v58, %v803_v1  ;;  %v458_v10 = vmul.f32 %v1508_v48, %v317_v44  ;;  %v459_v11 = vmul.f32 %v1516_v56, %v318_v55  ;;  %v808_v13 = vmul.f32 %v1510_v49, %v1603_v6 }
 0x124   : > { %v1613_v12 = vadd.f32 %v810_v5, %v809_v4  ;;  %v504_v15 = vadd.f32 %v457_v47, %v456_v2  ;;  %v788_v17 = vmul.f32 %v1510_v49, %v316_v36  ;;  %v789_v23 = vmul.f32 %v1518_v57, %v317_v44  ;;  %v326_v47 = vld [vmem:[%s1451_s7 + $0xd8] sm:$0xff]  ;;  %v328_v2 = vld [vmem:[%s1451_s7 + $0xe8] sm:$0xff]  ;;  %v327_v5 = vld [vmem:[%s1451_s7 + $0xe0] sm:$0xff] }
 0x125   : > { %821 = vadd.xlane.f32.xlu1 %v820_v16  ;;  %493 = vadd.xlane.f32.xlu0 %v492_v14  ;;  %v832_v14 = vadd.f32 %v786_v40, %v785_v39  ;;  %v787_v16 = vmul.f32 %v1501_v42, %v315_v43  ;;  %v1620_v19 = vadd.f32 %v808_v13, %v807_v9  ;;  %v323_v39 = vld [vmem:[%s1451_s7 + $0xc0] sm:$0xff] }
 0x126   : > { %v507_v20 = vadd.f32 %v459_v11, %v458_v10  ;;  %v790_v24 = vmul.f32 %v1526_v61, %v318_v55  ;;  %v460_v28 = vmul.f32 %v1494_v37, %v319_v21  ;;  %v463_v30 = vmul.f32 %v1516_v56, %v322_v27 }
 0x127   : > { %v835_v22 = vadd.f32 %v788_v17, %v787_v16  ;;  %v791_v33 = vmul.f32 %v1501_v42, %v319_v21  ;;  %v464_v53 = vmul.f32 %v1494_v37, %v323_v39  ;;  %v467_v0 = vmul.f32 %v1516_v56, %v326_v47 }
 0x128   : > { %v838_v31 = vadd.f32 %v790_v24, %v789_v23  ;;  %v795_v1 = vmul.f32 %v1501_v42, %v323_v39  ;;  %v798_v11 = vmul.f32 %v1526_v61, %v326_v47  ;;  %v469_v13 = vmul.f32 %v1499_v41, %v328_v2 }
 0x129   : > { %496 = vadd.xlane.f32.xlu1 %v495_v25  ;;  %824 = vadd.xlane.f32.xlu0 %v823_v26  ;;  %v461_v25 = vmul.f32 %v1499_v41, %v320_v18  ;;  %v321_v26 = vld [vmem:[%s1451_s7 + $0xb0] sm:$0xff]  ;;  %v468_v16 = vmul.f32 %v1494_v37, %v327_v5  ;;  %v472_v23 = vmul.f32 %v1494_v37, %v1562_v45 }
 0x12a   : > { %v462_v29 = vmul.f32 %v1508_v48, %v321_v26  ;;  %v793_v36 = vmul.f32 %v1518_v57, %v321_v26  ;;  %v474_v26 = vmul.f32 %v1508_v48, %v1569_v51  ;;  %v479_v45 = vmul.f32 %v1516_v56, %v1582_v60 }
 0x12b   : > { %v510_v32 = vadd.f32 %v461_v25, %v460_v28  ;;  %v522_v21 = vadd.f32 %v469_v13, %v468_v16  ;;  %v477_v28 = vmul.f32 %v1499_v41, %v1603_v6  ;;  %v799_v51 = vmul.f32 %v1501_v42, %v327_v5 }
 0x12c   : > { %v513_v40 = vadd.f32 %v463_v30, %v462_v29  ;;  %v478_v29 = vmul.f32 %v1508_v48, %v1579_v59  ;;  %v560_v42 = vlaneseq }
 0x12d   : > { %827 = vadd.xlane.f32.xlu1 %v826_v34  ;;  %499 = vadd.xlane.f32.xlu0 %v498_v35  ;;  %v792_v34 = vmul.f32 %v1510_v49, %v320_v18  ;;  %v324_v35 = vld [vmem:[%s1451_s7 + $0xc8] sm:$0xff] }
 0x12e   : > { %v465_v44 = vmul.f32 %v1499_v41, %v324_v35  ;;  %v796_v58 = vmul.f32 %v1510_v49, %v324_v35 }
 0x12f   : > { %v841_v43 = vadd.f32 %v792_v34, %v791_v33 }
 0x130   : > { %v516_v63 = vadd.f32 %v465_v44, %v464_v53  ;;  %v847_v10 = vadd.f32 %v796_v58, %v795_v1 }
 0x131   : > { %502 = vadd.xlane.f32.xlu1 %v501_v38  ;;  %830 = vadd.xlane.f32.xlu0 %v829_v46  ;;  %v794_v38 = vmul.f32 %v1526_v61, %v322_v27  ;;  %v325_v46 = vld [vmem:[%s1451_s7 + $0xd0] sm:$0xff]  ;;  %v475_v27 = vmul.f32 %v1516_v56, %v1572_v52  ;;  %v800_v52 = vmul.f32 %v1510_v49, %v328_v2  ;;  %v561_v49 = vand.u32 127, %v560_v42 }
 0x132   : > { %v466_v55 = vmul.f32 %v1508_v48, %v325_v46  ;;  %v797_v4 = vmul.f32 %v1518_v57, %v325_v46 }
 0x133   : > { %v844_v54 = vadd.f32 %v794_v38, %v793_v36  ;;  %v531_v30 = vadd.f32 %v475_v27, %v474_v26  ;;  %v853_v6 = vadd.f32 %v800_v52, %v799_v51 }
 0x134   : > { %v519_v9 = vadd.f32 %v467_v0, %v466_v55 }
 0x135   : > { %833 = vadd.xlane.f32.xlu1 %v832_v14  ;;  %505 = vadd.xlane.f32.xlu0 %v504_v15  ;;  %v329_v14 = vld [vmem:[%s1451_s7 + $0xf0] sm:$0xff]  ;;  %v330_v15 = vld [vmem:[%s1451_s7 + $0xf8] sm:$0xff] }
 0x136   : > { %v470_v17 = vmul.f32 %v1508_v48, %v329_v14  ;;  %v471_v18 = vmul.f32 %v1516_v56, %v330_v15  ;;  %v563_v56 = vshrl.u32 %v560_v42, 7 }
 0x138   : > { %v525_v24 = vadd.f32 %v471_v18, %v470_v17  ;;  %v1682_v60 = vsub.s32 %v561_v49, %v563_v56 }
 0x139   : > { %508 = vadd.xlane.f32.xlu1 %v507_v20  ;;  %836 = vadd.xlane.f32.xlu0 %v835_v22  ;;  %v850_v20 = vadd.f32 %v798_v11, %v797_v4  ;;  %v473_v22 = vmul.f32 %v1499_v41, %v1566_v50  ;;  %v476_v50 = vmul.f32 %v1494_v37, %v1594_v62 }
 0x13a   : > { %v537_v41 = vadd.f32 %v479_v45, %v478_v29  ;;  %v802_v37 = vmul.f32 %v1526_v61, %v330_v15 }
 0x13b   : > { %v528_v25 = vadd.f32 %v473_v22, %v472_v23 }
 0x13d   : > { %839 = vadd.xlane.f32.xlu1 %v838_v31  ;;  %511 = vadd.xlane.f32.xlu0 %v510_v32  ;;  %v534_v31 = vadd.f32 %v477_v28, %v476_v50  ;;  %v801_v32 = vmul.f32 %v1518_v57, %v329_v14  ;;  %v566_v57 = vadd.s32 4294967288, %v561_v49 }
 0x13f   : > { %v856_v48 = vadd.f32 %v802_v37, %v801_v32  ;;  %v1684_v62 = vsub.s32 %v566_v57, %v563_v56 }
 0x141   : > { %514 = vadd.xlane.f32.xlu1 %v513_v40  ;;  %842 = vadd.xlane.f32.xlu0 %v841_v43 }
 0x145   : > { %845 = vadd.xlane.f32.xlu1 %v844_v54  ;;  %517 = vadd.xlane.f32.xlu0 %v516_v63 }
 0x149   : > { %520 = vadd.xlane.f32.xlu1 %v519_v9  ;;  %848 = vadd.xlane.f32.xlu0 %v847_v10 }
 0x14d   : > { %851 = vadd.xlane.f32.xlu1 %v850_v20  ;;  %523 = vadd.xlane.f32.xlu0 %v522_v21 }
 0x151   : > { %526 = vadd.xlane.f32.xlu1 %v525_v24  ;;  %529 = vadd.xlane.f32.xlu0 %v528_v25 }
 0x155   : > { %532 = vadd.xlane.f32.xlu1 %v531_v30  ;;  %535 = vadd.xlane.f32.xlu0 %v534_v31 }
 0x159   : > { %538 = vadd.xlane.f32.xlu1 %v537_v41  ;;  %854 = vadd.xlane.f32.xlu0 %v853_v6 }
 0x15d   : > { %857 = vadd.xlane.f32.xlu1 %v856_v48  ;;  %484 = vadd.xlane.f32.xlu0 %v1596_v3 }
 0x161   : > { %863 = vadd.xlane.f32.xlu1 %v1605_v7  ;;  %860 = vadd.xlane.f32.xlu0 %v1607_v8 }
 0x165   : > { %869 = vadd.xlane.f32.xlu1 %v1613_v12  ;;  %866 = vadd.xlane.f32.xlu0 %v1620_v19 }
 0x1a2   : > { %v488_v59 = vpop.xlane.xlu1 %487  ;;  %v1680_v61 = vpop.xlane.xlu0 %481 }
 0x1a3   : > { %v576_v8 = vrot.slane %v488_v59, %v1682_v60  ;;  %v565_v50 = vrot.slane %v1680_v61, %v1682_v60 }
 0x1a6   : > { %v491_v3 = vpop.xlane.xlu1 %490  ;;  %v813_v7 = vpop.xlane.xlu0 %812 }
 0x1a7   : > { %v580_v12 = vrot.slane %v491_v3, %v1684_v62  ;;  %v894_v35 = vrot.slane %v813_v7, %v1682_v60 }
 0x1a9   : > { %v1689_v19 = vsel %vm571_vm4, %v580_v12, %v576_v8 }
 0x1aa   : > { %v816_v33 = vpop.xlane.xlu1 %815  ;;  %v819_v34 = vpop.xlane.xlu0 %818 }
 0x1ab   : > { %v898_v36 = vrot.slane %v816_v33, %v1684_v62  ;;  %v903_v43 = vrot.slane %v819_v34, %v1682_v60 }
 0x1ad   : > { %v899_v38 = vsel %vm571_vm4, %v898_v36, %v894_v35 }
 0x1ae   : > { %v822_v39 = vpop.xlane.xlu1 %821  ;;  %v494_v40 = vpop.xlane.xlu0 %493 }
 0x1af   : > { %v907_v44 = vrot.slane %v822_v39, %v1684_v62  ;;  %v585_v29 = vrot.slane %v494_v40, %v1682_v60 }
 0x1b1   : > { %v908_v46 = vsel %vm571_vm4, %v907_v44, %v903_v43 }
 0x1b2   : > { %v497_v47 = vpop.xlane.xlu1 %496  ;;  %v825_v53 = vpop.xlane.xlu0 %824  ;;  %v981_v54 = vsel %vm654_vm5, %v908_v46, %v899_v38 }
 0x1b3   : > { %v589_v26 = vrot.slane %v497_v47, %v1684_v62  ;;  %v912_v45 = vrot.slane %v825_v53, %v1682_v60 }
 0x1b5   : > { %v590_v56 = vsel %vm571_vm4, %v589_v26, %v585_v29 }
 0x1b6   : > { %v828_v55 = vpop.xlane.xlu1 %827  ;;  %v500_v63 = vpop.xlane.xlu0 %499 }
 0x1b7   : > { %v916_v25 = vrot.slane %v828_v55, %v1684_v62  ;;  %v594_v3 = vrot.slane %v500_v63, %v1682_v60 }
 0x1b9   : > { %v917_v37 = vsel %vm571_vm4, %v916_v25, %v912_v45 }
 0x1ba   : > { %v503_v0 = vpop.xlane.xlu1 %502  ;;  %v831_v1 = vpop.xlane.xlu0 %830  ;;  %v982_v39 = vsel %vm656_vm6, %v917_v37, %v981_v54 }
 0x1bb   : > { %v921_v52 = vrot.slane %v831_v1, %v1682_v60  ;;  %v598_v48 = vrot.slane %v503_v0, %v1684_v62 }
 0x1bd   : > { %v599_v40 = vsel %vm571_vm4, %v598_v48, %v594_v3 }
 0x1be   : > { %v834_v58 = vpop.xlane.xlu1 %833  ;;  %v506_v2 = vpop.xlane.xlu0 %505 }
 0x1bf   : > { %v925_v27 = vrot.slane %v834_v58, %v1684_v62  ;;  %v603_v7 = vrot.slane %v506_v2, %v1682_v60 }
 0x1c1   : > { %v926_v57 = vsel %vm571_vm4, %v925_v27, %v921_v52 }
 0x1c2   : > { %v509_v4 = vpop.xlane.xlu1 %508  ;;  %v837_v5 = vpop.xlane.xlu0 %836  ;;  %v983_v46 = vsel %vm658_vm7, %v926_v57, %v982_v39  ;;  %v997_v57 = vld [vmem:[%s1462_s6] sm:$0xff] }
 0x1c3   : > { %v607_v42 = vrot.slane %v509_v4, %v1684_v62  ;;  %v930_v49 = vrot.slane %v837_v5, %v1682_v60 }
 0x1c5   : > { %v608_v43 = vsel %vm571_vm4, %v607_v42, %v603_v7  ;;  %v998_v42 = vld [vmem:[%s1462_s6 + $0x8] sm:$0x3] }
 0x1c6   : > { %v840_v9 = vpop.xlane.xlu1 %839  ;;  %v1698_v10 = vpop.xlane.xlu0 %511 }
 0x1c7   : > { %v934_v30 = vrot.slane %v840_v9, %v1684_v62  ;;  %v612_v47 = vrot.slane %v1698_v10, %v1682_v60 }
 0x1c9   : > { %v935_v8 = vsel %vm571_vm4, %v934_v30, %v930_v49 }
 0x1ca   : > { %v1700_v11 = vpop.xlane.xlu1 %514  ;;  %v1702_v13 = vpop.xlane.xlu0 %842  ;;  %v984_v54 = vsel %vm660_vm8, %v935_v8, %v983_v46 }
 0x1cb   : > { %v616_v35 = vrot.slane %v1700_v11, %v1684_v62  ;;  %v939_v53 = vrot.slane %v1702_v13, %v1682_v60 }
 0x1cd   : > { %v617_v5 = vsel %vm571_vm4, %v616_v35, %v612_v47 }
 0x1ce   : > { %v1704_v14 = vpop.xlane.xlu1 %845  ;;  %v1706_v15 = vpop.xlane.xlu0 %517 }
 0x1cf   : > { %v943_v44 = vrot.slane %v1704_v14, %v1684_v62  ;;  %v621_v9 = vrot.slane %v1706_v15, %v1682_v60 }
 0x1d1   : > { %v944_v13 = vsel %vm571_vm4, %v943_v44, %v939_v53 }
 0x1d2   : > { %v1708_v16 = vpop.xlane.xlu1 %520  ;;  %v1710_v17 = vpop.xlane.xlu0 %848  ;;  %v985_v30 = vsel %vm662_vm10, %v944_v13, %v984_v54 }
 0x1d3   : > { %v625_v63 = vrot.slane %v1708_v16, %v1684_v62  ;;  %v948_v14 = vrot.slane %v1710_v17, %v1682_v60 }
 0x1d6   : > { %v1712_v18 = vpop.xlane.xlu1 %851  ;;  %v1714_v20 = vpop.xlane.xlu0 %523 }
 0x1d7   : > { %v952_v0 = vrot.slane %v1712_v18, %v1684_v62  ;;  %v630_v16 = vrot.slane %v1714_v20, %v1682_v60 }
 0x1da   : > { %v1716_v21 = vpop.xlane.xlu1 %526  ;;  %v530_v22 = vpop.xlane.xlu0 %529 }
 0x1db   : > { %v639_v41 = vrot.slane %v530_v22, %v1682_v60  ;;  %v634_v1 = vrot.slane %v1716_v21, %v1684_v62 }
 0x1dd   : > { %v635_v26 = vsel %vm571_vm4, %v634_v1, %v630_v16 }
 0x1de   : > { %v533_v23 = vpop.xlane.xlu1 %532  ;;  %v536_v24 = vpop.xlane.xlu0 %535 }
 0x1df   : > { %v643_v28 = vrot.slane %v533_v23, %v1684_v62  ;;  %v648_v6 = vrot.slane %v536_v24, %v1682_v60  ;;  %v626_v23 = vsel %vm571_vm4, %v625_v63, %v621_v9  ;;  %v953_v24 = vsel %vm571_vm4, %v952_v0, %v948_v14 }
 0x1e1   : > { %v644_v59 = vsel %vm571_vm4, %v643_v28, %v639_v41 }
 0x1e2   : > { %v539_v31 = vpop.xlane.xlu1 %538  ;;  %v1727_v51 = vpop.xlane.xlu0 %854 }
 0x1e3   : > { %v652_v32 = vrot.slane %v539_v31, %v1684_v62  ;;  %v957_v18 = vrot.slane %v1727_v51, %v1682_v60 }
 0x1e5   : > { %v653_v61 = vsel %vm571_vm4, %v652_v32, %v648_v6 }
 0x1e6   : > { %v858_v12 = vpop.xlane.xlu1 %857  ;;  %v485_v33 = vpop.xlane.xlu0 %484  ;;  %v668_v34 = vsel %vm654_vm5, %v653_v61, %v644_v59 }
 0x1e7   : > { %v570_v36 = vrot.slane %v485_v33, %v1684_v62  ;;  %v676_v38 = vsel %vm675_vm9, %v668_v34, 0.0  ;;  %v961_v10 = vrot.slane %v858_v12, %v1684_v62 }
 0x1e8   : > { %677 = vadd.xlane.f32.xlu1 %v676_v38 }
 0x1e9   : > { %v572_v55 = vsel %vm571_vm4, %v570_v36, %v565_v50  ;;  %v962_v29 = vsel %vm571_vm4, %v961_v10, %v957_v18 }
 0x1ea   : > { %v655_v58 = vsel %vm654_vm5, %v1689_v19, %v572_v55  ;;  %v864_v2 = vpop.xlane.xlu1 %863  ;;  %v861_v4 = vpop.xlane.xlu0 %860 }
 0x1eb   : > { %v657_v11 = vsel %vm656_vm6, %v590_v56, %v655_v58  ;;  %v970_v21 = vrot.slane %v864_v2, %v1684_v62  ;;  %v966_v15 = vrot.slane %v861_v4, %v1682_v60 }
 0x1ec   : > { %v659_v19 = vsel %vm658_vm7, %v599_v40, %v657_v11 }
 0x1ed   : > { %v661_v22 = vsel %vm660_vm8, %v608_v43, %v659_v19  ;;  %v971_v51 = vsel %vm571_vm4, %v970_v21, %v966_v15 }
 0x1ee   : > { %v870_v25 = vpop.xlane.xlu1 %869  ;;  %v867_v17 = vpop.xlane.xlu0 %866  ;;  %v663_v20 = vsel %vm662_vm10, %v617_v5, %v661_v22 }
 0x1ef   : > { %v979_v27 = vrot.slane %v870_v25, %v1684_v62  ;;  %v975_v28 = vrot.slane %v867_v17, %v1682_v60  ;;  %v665_v50 = vsel %vm664_vm11, %v626_v23, %v663_v20  ;;  %v986_v62 = vsel %vm664_vm11, %v953_v24, %v985_v30 }
 0x1f0   : > { %v667_v45 = vsel %vm666_vm12, %v635_v26, %v665_v50  ;;  %v987_v41 = vsel %vm666_vm12, %v962_v29, %v986_v62 }
 0x1f1   : > { %v672_v31 = vsel %vm671_vm13, %v667_v45, 0.0  ;;  %v980_v52 = vsel %vm571_vm4, %v979_v27, %v975_v28  ;;  %v991_v32 = vsel %vm671_vm13, %v987_v41, 0.0 }
 0x1f2   : > { %673 = vadd.xlane.f32.xlu0 %v672_v31  ;;  %v988_v60 = vsel %vm654_vm5, %v980_v52, %v971_v51 }
 0x1f3   : > { %v994_v6 = vsel %vm675_vm9, %v988_v60, 0.0 }
 0x1f4   : > { %995 = vadd.xlane.f32.xlu1 %v994_v6 }
 0x1f6   : > { %992 = vadd.xlane.f32.xlu0 %v991_v32 }
 0x271   : > { %v678_v37 = vpop.xlane.xlu1 %677 }
 0x27b   : > { %v674_v48 = vpop.xlane.xlu0 %673 }
 0x27d   : > { %v996_v49 = vpop.xlane.xlu1 %995 }
 0x27e   : > { %v1001_v56 = vsel %vm999_vm14, %v678_v37, %v996_v49 }
 0x27f   : > { %v1003_v59 = vadd.f32 %v1001_v56, %v998_v42  ;;  %v993_v61 = vpop.xlane.xlu0 %992 }
 0x280   : > { %v1000_v3 = vsel %vm999_vm14, %v674_v48, %v993_v61 }
 0x281   : > { %1007 = vst.msk [vmem:[%s1462_s6 + $0x8] sm:$0x3] %vm1006_vm15, %v1003_v59  ;;  %v1002_v7 = vadd.f32 %v1000_v3, %v997_v57 }
 0x283   : > { %1005 = vst.msk [vmem:[%s1462_s6] sm:$0xff] %vm1004_vm0, %v1002_v7 }
 0x284 PF: > { %s16_s19 = sadd.s32 1, %s1314_s19   ;;  %s1835_s12 = smov %s1290_s13 }
 0x285   : > { %p13_p7 = scmp.ge.s32.totalorder %s16_s19, 6   ;;  %s1836_s13 = smov %s1294_s14 }
 0x286   : > { %s1837_s14 = smov %s1409_s4  ;;  %s1838_s15 = smov %s1306_s17 }
 0x287   : > { %s1839_s16 = smov %s1310_s18  ;;  %s1840_s17 = smov %s1843_s20 }
 0x288   : > { %s1841_s18 = smov %s1847_s21  ;;  %15 = sbr.rel (!%p13_p7) target bundleno = 5 (0x5), region = 108 }
 0x28d   :  { %1029 = vsyncpa [#allocation4], 1 }
 0x28e   :  { %1031 = vsyncpa [#allocation4 + $0x1], 1 }

</bundles_post_ra>
